<compile_context>
chip_gen: v6e
topology: v6e:2x2x1
jax: 0.10.0
libtpu: 0.0.40
codegen_flags: <defaults>
</compile_context>

<pallas_src>
import jax
import jax.numpy as jnp
from jax import lax
from jax.experimental import pallas as pl
from jax.experimental.pallas import tpu as pltpu


# --------------------------------------------------------------------------
# Pass 1: per row-block, accumulate node degrees (column sums of adj) over k,
#         then finalize  d = (deg + 1)^-1/2  and  S_d = d * (x @ W + b).
# --------------------------------------------------------------------------
def _prep_kernel(x_ref, adj_ref, w_ref, b_ref, d_ref, s_ref, deg_acc):
    k = pl.program_id(1)
    nk = pl.num_programs(1)

    @pl.when(k == 0)
    def _():
        deg_acc[...] = jnp.zeros_like(deg_acc)

    # Column sums of this adj tile, produced directly in [TM, 1] layout by
    # contracting dim 0 on the MXU (avoids a lane->sublane transpose).
    ones = jnp.ones((adj_ref.shape[0], 1), dtype=jnp.float32)
    deg_acc[...] += lax.dot_general(
        adj_ref[...], ones,
        dimension_numbers=(((0,), (0,)), ((), ())),
        preferred_element_type=jnp.float32)

    @pl.when(k == nk - 1)
    def _():
        # A_gcn = adj + I  =>  deg = colsum(adj) + 1 ; d = deg^-1/2 (EUP rsqrt).
        d = lax.rsqrt(deg_acc[...] + 1.0)                       # [TM, 1] f32
        d_ref[...] = d
        # Linear layer on this row block, then row-scale by d.
        support = jnp.dot(x_ref[...], w_ref[...],
                          preferred_element_type=jnp.float32) + b_ref[...]
        s_ref[...] = (support * d).astype(s_ref.dtype)


# --------------------------------------------------------------------------
# Pass 2: out[i-block] = d * (adj[i,:] @ S_d + S_d[i-block])
#         (the "+ S_d" term is the folded identity matrix).
# --------------------------------------------------------------------------
def _agg_kernel(adj_ref, s_ref, s_self_ref, d_ref, out_ref, acc_ref):
    k = pl.program_id(1)
    nk = pl.num_programs(1)

    @pl.when(k == 0)
    def _():
        acc_ref[...] = jnp.zeros_like(acc_ref)

    acc_ref[...] += jnp.dot(adj_ref[...], s_ref[...],
                            preferred_element_type=jnp.float32)

    @pl.when(k == nk - 1)
    def _():
        agg = acc_ref[...] + s_self_ref[...].astype(jnp.float32)
        out_ref[...] = (agg * d_ref[...]).astype(out_ref.dtype)


def gc_forward(x, adj, w, b, *, tile=128, use_bf16=True):
    """GCN layer: d * ((adj + I) @ (d * (x @ w + b))), d = colsum(adj + I)^-0.5."""
    n, fin = x.shape
    fout = w.shape[1]
    compute_dtype = jnp.bfloat16 if use_bf16 else jnp.float32

    # Pad node count to a tile multiple and feature width to a lane-dense 128
    # multiple (padded nodes have degree 0 -> +1 self loop, so no NaNs; padded
    # rows/columns are sliced off at the end).
    npad = -n % tile
    fpad = -fout % 128
    n_p, f_p = n + npad, fout + fpad

    x_p = jnp.pad(x.astype(jnp.float32), ((0, npad), (0, 0)))
    adj_p = jnp.pad(adj.astype(jnp.float32), ((0, npad), (0, npad)))
    w_p = jnp.pad(w.astype(jnp.float32), ((0, 0), (0, fpad)))
    b_p = jnp.pad(b.astype(jnp.float32).reshape(1, fout), ((0, 0), (0, fpad)))

    nb = n_p // tile

    # ---- Pass 1: d [N,1] and row-scaled support S_d [N, Fp] --------------
    d, s_d = pl.pallas_call(
        _prep_kernel,
        out_shape=(
            jax.ShapeDtypeStruct((n_p, 1), jnp.float32),
            jax.ShapeDtypeStruct((n_p, f_p), compute_dtype),
        ),
        grid_spec=pltpu.PrefetchScalarGridSpec(
            num_scalar_prefetch=0,
            grid=(nb, nb),                     # (i: node row-block, k: reduction)
            in_specs=[
                pl.BlockSpec((tile, fin), lambda i, k: (i, 0)),     # x
                pl.BlockSpec((tile, tile), lambda i, k: (k, i)),    # adj[k, i]
                pl.BlockSpec((fin, f_p), lambda i, k: (0, 0)),      # W
                pl.BlockSpec((1, f_p), lambda i, k: (0, 0)),        # b
            ],
            out_specs=(
                pl.BlockSpec((tile, 1), lambda i, k: (i, 0)),       # d
                pl.BlockSpec((tile, f_p), lambda i, k: (i, 0)),     # S_d
            ),
            scratch_shapes=[pltpu.VMEM((tile, 1), jnp.float32)],
        ),
        compiler_params=pltpu.CompilerParams(
            dimension_semantics=("parallel", "arbitrary")),
    )(x_p, adj_p, w_p, b_p)

    # ---- Pass 2: out = d * (adj @ S_d + S_d) -----------------------------
    adj_c = adj_p.astype(compute_dtype)        # bf16 adj halves the N^2 stream
    out_p = pl.pallas_call(
        _agg_kernel,
        out_shape=jax.ShapeDtypeStruct((n_p, f_p), jnp.float32),
        grid_spec=pltpu.PrefetchScalarGridSpec(
            num_scalar_prefetch=0,
            grid=(nb, nb),                     # (i: output row-block, k: reduction)
            in_specs=[
                pl.BlockSpec((tile, tile), lambda i, k: (i, k)),    # adj[i, k]
                pl.BlockSpec((tile, f_p), lambda i, k: (k, 0)),     # S_d (streamed)
                pl.BlockSpec((tile, f_p), lambda i, k: (i, 0)),     # S_d (identity term)
                pl.BlockSpec((tile, 1), lambda i, k: (i, 0)),       # d
            ],
            out_specs=pl.BlockSpec((tile, f_p), lambda i, k: (i, 0)),
            scratch_shapes=[pltpu.VMEM((tile, f_p), jnp.float32)],
        ),
        compiler_params=pltpu.CompilerParams(
            dimension_semantics=("parallel", "arbitrary")),
    )(adj_c, s_d, s_d, d)

    return out_p[:n, :fout]


def reference(x, adj, w, b):
    support = jnp.dot(x, w, precision=lax.Precision.HIGHEST) + b
    a_gcn = adj + jnp.eye(adj.shape[0], dtype=adj.dtype)
    d = jnp.power(jnp.sum(a_gcn, axis=0), -0.5)[:, None]
    return d * jnp.dot(a_gcn, d * support, precision=lax.Precision.HIGHEST)


if __name__ == "__main__":
    key = jax.random.PRNGKey(0)
    N, FIN, FOUT = 256, 32, 16

    kx, ka, kw, kb = jax.random.split(key, 4)
    x = jax.random.normal(kx, (N, FIN), dtype=jnp.float32)

    # Symmetric, nonnegative adjacency (dense stand-in for the sparse adj).
    a_raw = (jax.random.uniform(ka, (N, N)) > 0.7).astype(jnp.float32)
    adj = jnp.maximum(a_raw, a_raw.T)

    # nn.Linear(in_features, out_features) init: U(-1/sqrt(FIN), 1/sqrt(FIN)).
    bound = 1.0 / (FIN ** 0.5)
    w = jax.random.uniform(kw, (FIN, FOUT), minval=-bound, maxval=bound,
                           dtype=jnp.float32)
    b = jax.random.uniform(kb, (1, FOUT), minval=-bound, maxval=bound,
                           dtype=jnp.float32)

    ref = reference(x, adj, w, b)

    # f32 MXU path (tight check).
    out_f32 = gc_forward(x, adj, w, b, use_bf16=False)
    jax.block_until_ready(out_f32)
    assert out_f32.shape == (N, FOUT)
    assert jnp.allclose(out_f32, ref, atol=1e-3, rtol=1e-3)

    # bf16 MXU fast path (v6e/v7x); f32 accumulation + f32 epilogue bound the error.
    out_bf16 = gc_forward(x, adj, w, b, use_bf16=True)
    jax.block_until_ready(out_bf16)
    assert out_bf16.shape == (N, FOUT)
    assert jnp.allclose(out_bf16, ref, atol=5e-2, rtol=5e-2)

    print("KERNEL_OK")
</pallas_src>

<mosaic_0001>
module attributes {stable_mosaic.version = 11 : i64} {
  func.func @_prep_kernel(%arg0: i32, %arg1: i32, %arg2: memref<128x32xf32, #tpu.memory_space<vmem>>, %arg3: memref<128x128xf32, #tpu.memory_space<vmem>>, %arg4: memref<32x128xf32, #tpu.memory_space<vmem>>, %arg5: memref<1x128xf32, #tpu.memory_space<vmem>>, %arg6: memref<128x1xf32, #tpu.memory_space<vmem>>, %arg7: memref<128x128xf32, #tpu.memory_space<vmem>>, %arg8: memref<128x1xf32, #tpu.memory_space<vmem>>) attributes {dimension_semantics = [#tpu.dimension_semantics<parallel>, #tpu.dimension_semantics<arbitrary>], iteration_bounds = array<i64: 2, 2>, scalar_prefetch = 0 : i64, scratch_operands = 1 : i64, tpu.core_type = #tpu.core_type<tc>, window_params = [{transform_indices = @transform_0, window_bounds = array<i64: 128, 32>}, {transform_indices = @transform_1, window_bounds = array<i64: 128, 128>}, {pipeline_mode = #tpu.pipeline_mode<synchronous>, transform_indices = @transform_2, window_bounds = array<i64: 32, 128>}, {pipeline_mode = #tpu.pipeline_mode<synchronous>, transform_indices = @transform_3, window_bounds = array<i64: 1, 128>}, {transform_indices = @transform_4, window_bounds = array<i64: 128, 1>}, {transform_indices = @transform_5, window_bounds = array<i64: 128, 128>}]} {
    %c0_i32 = arith.constant 0 : i32
    %0 = arith.cmpi eq, %arg1, %c0_i32 : i32
    %1 = arith.extui %0 : i1 to i32
    %c0_i32_0 = arith.constant 0 : i32
    %2 = arith.cmpi ne, %1, %c0_i32_0 : i32
    scf.if %2 {
      %cst_8 = arith.constant 0.000000e+00 : f32
      %12 = vector.broadcast %cst_8 : f32 to vector<128x1xf32>
      %c0_9 = arith.constant 0 : index
      %c0_10 = arith.constant 0 : index
      %13 = vector.load %arg8[%c0_9, %c0_10] : memref<128x1xf32, #tpu.memory_space<vmem>>, vector<128x1xf32>
      tpu.vector_store %arg8[%c0_9, %c0_10], %12 {strides = array<i32>} : memref<128x1xf32, #tpu.memory_space<vmem>>, vector<128x1xf32>,
    } else {
    }
    %cst = arith.constant 1.000000e+00 : f32
    %3 = vector.broadcast %cst : f32 to vector<128x1xf32>
    %c0 = arith.constant 0 : index
    %c0_1 = arith.constant 0 : index
    %4 = vector.load %arg8[%c0, %c0_1] : memref<128x1xf32, #tpu.memory_space<vmem>>, vector<128x1xf32>
    %c0_2 = arith.constant 0 : index
    %c0_3 = arith.constant 0 : index
    %5 = vector.load %arg3[%c0_2, %c0_3] : memref<128x128xf32, #tpu.memory_space<vmem>>, vector<128x128xf32>
    %cst_4 = arith.constant dense<0.000000e+00> : vector<128x1xf32>
    %6 = tpu.matmul %5, %3, %cst_4 {dimension_numbers = #tpu.dot_dimension_numbers<[0], [0], [1], [1], [0, 1, 1, 1], [], []>} : vector<128x128xf32>, vector<128x1xf32>, vector<128x1xf32> -> vector<128x1xf32>
    %7 = arith.addf %4, %6 : vector<128x1xf32>
    %c0_5 = arith.constant 0 : index
    %c0_6 = arith.constant 0 : index
    %8 = vector.load %arg8[%c0_5, %c0_6] : memref<128x1xf32, #tpu.memory_space<vmem>>, vector<128x1xf32>
    tpu.vector_store %arg8[%c0_5, %c0_6], %7 {strides = array<i32>} : memref<128x1xf32, #tpu.memory_space<vmem>>, vector<128x1xf32>,
    %c1_i32 = arith.constant 1 : i32
    %9 = arith.cmpi eq, %arg1, %c1_i32 : i32
    %10 = arith.extui %9 : i1 to i32
    %c0_i32_7 = arith.constant 0 : i32
    %11 = arith.cmpi ne, %10, %c0_i32_7 : i32
    scf.if %11 {
      %c0_8 = arith.constant 0 : index
      %c0_9 = arith.constant 0 : index
      %12 = vector.load %arg8[%c0_8, %c0_9] : memref<128x1xf32, #tpu.memory_space<vmem>>, vector<128x1xf32>
      %cst_10 = arith.constant 1.000000e+00 : f32
      %13 = vector.broadcast %cst_10 : f32 to vector<128x1xf32>
      %14 = arith.addf %12, %13 : vector<128x1xf32>
      %15 = math.rsqrt %14 : vector<128x1xf32>
      %c0_11 = arith.constant 0 : index
      %c0_12 = arith.constant 0 : index
      %16 = vector.load %arg6[%c0_11, %c0_12] : memref<128x1xf32, #tpu.memory_space<vmem>>, vector<128x1xf32>
      tpu.vector_store %arg6[%c0_11, %c0_12], %15 {strides = array<i32>} : memref<128x1xf32, #tpu.memory_space<vmem>>, vector<128x1xf32>,
      %c0_13 = arith.constant 0 : index
      %c0_14 = arith.constant 0 : index
      %17 = vector.load %arg2[%c0_13, %c0_14] : memref<128x32xf32, #tpu.memory_space<vmem>>, vector<128x32xf32>
      %c0_15 = arith.constant 0 : index
      %c0_16 = arith.constant 0 : index
      %18 = vector.load %arg4[%c0_15, %c0_16] : memref<32x128xf32, #tpu.memory_space<vmem>>, vector<32x128xf32>
      %cst_17 = arith.constant dense<0.000000e+00> : vector<128x128xf32>
      %19 = tpu.matmul %17, %18, %cst_17 {dimension_numbers = #tpu.dot_dimension_numbers<[1], [0], [0], [1], [0, 0, 1, 1], [], []>} : vector<128x32xf32>, vector<32x128xf32>, vector<128x128xf32> -> vector<128x128xf32>
      %c0_18 = arith.constant 0 : index
      %c0_19 = arith.constant 0 : index
      %20 = vector.load %arg5[%c0_18, %c0_19] : memref<1x128xf32, #tpu.memory_space<vmem>>, vector<1x128xf32>
      %21 = vector.broadcast %20 : vector<1x128xf32> to vector<128x128xf32>
      %22 = arith.addf %19, %21 : vector<128x128xf32>
      %23 = vector.broadcast %15 : vector<128x1xf32> to vector<128x128xf32>
      %24 = arith.mulf %22, %23 : vector<128x128xf32>
      %c0_20 = arith.constant 0 : index
      %c0_21 = arith.constant 0 : index
      %25 = vector.load %arg7[%c0_20, %c0_21] : memref<128x128xf32, #tpu.memory_space<vmem>>, vector<128x128xf32>
      tpu.vector_store %arg7[%c0_20, %c0_21], %24 {strides = array<i32>} : memref<128x128xf32, #tpu.memory_space<vmem>>, vector<128x128xf32>,
    } else {
    }
    return
  }
  func.func @transform_0(%arg0: i32, %arg1: i32) -> (i32, i32) {
    %c0_i32 = arith.constant 0 : i32
    %c0_i32_0 = arith.constant 0 : i32
    return %arg0, %c0_i32 : i32, i32
  }
  func.func @transform_1(%arg0: i32, %arg1: i32) -> (i32, i32) {
    %c0_i32 = arith.constant 0 : i32
    return %arg1, %arg0 : i32, i32
  }
  func.func @transform_2(%arg0: i32, %arg1: i32) -> (i32, i32) {
    %c0_i32 = arith.constant 0 : i32
    %c0_i32_0 = arith.constant 0 : i32
    %c0_i32_1 = arith.constant 0 : i32
    return %c0_i32, %c0_i32_0 : i32, i32
  }
  func.func @transform_3(%arg0: i32, %arg1: i32) -> (i32, i32) {
    %c0_i32 = arith.constant 0 : i32
    %c0_i32_0 = arith.constant 0 : i32
    %c0_i32_1 = arith.constant 0 : i32
    return %c0_i32, %c0_i32_0 : i32, i32
  }
  func.func @transform_4(%arg0: i32, %arg1: i32) -> (i32, i32) {
    %c0_i32 = arith.constant 0 : i32
    %c0_i32_0 = arith.constant 0 : i32
    return %arg0, %c0_i32 : i32, i32
  }
  func.func @transform_5(%arg0: i32, %arg1: i32) -> (i32, i32) {
    %c0_i32 = arith.constant 0 : i32
    %c0_i32_0 = arith.constant 0 : i32
    return %arg0, %c0_i32 : i32, i32
  }
}

</mosaic_0001>

<bundles_post_ra>
// kernel: tpu_custom_call.1
= control target key start
LH: loop header
LB: loop body
LE: loop exit
PB: predicated region body
PF: predicated region fallthrough
CT: control target
= control target key end

     0   :  { %s2106_s0 = inlined_call_operand.vmem [shape: f32[256,32], index: 0, kind: input, shape index: {}]   ;;  %s2107_s1 = inlined_call_operand.hbm [shape: f32[256,256], index: 1, kind: input, shape index: {}]   ;;  %s2108_s2 = inlined_call_operand.vmem [shape: f32[32,128], index: 2, kind: input, shape index: {}]   ;;  %s2109_s3 = inlined_call_operand.vmem [shape: f32[1,128], index: 3, kind: input, shape index: {}]   ;;  %s2110_s4 = inlined_call_operand.vmem [shape: f32[256,1], index: 4, kind: output, shape index: {0}]   ;;  %s2111_s5 = inlined_call_operand.hbm [shape: f32[256,128], index: 5, kind: output, shape index: {1}]  }
   0x1   :  { %2118 = sst [smem:[#allocation14_spill]] %s2111_s5 }
   0x2   :  { %11 = vsyncpa [#allocation4], 0 }
   0x3   :  { %13 = vsyncpa [#allocation4 + $0x1], 0 }
   0x4   :  { %14 = vsyncpa [#allocation5], 0 }
   0x5   :  { %16 = vsyncpa [#allocation5 + $0x1], 0  ;;  %s1662_s18 = smov 0   ;;  %s1664_s19 = smov 0  }
   0x6   :  { %s1666_s20 = smov 0   ;;  %s1668_s21 = smov 0  }
   0x7   :  { %s1670_s22 = smov 0   ;;  %s1672_s23 = smov 0  }
   0x8   :  { %s1674_s24 = smov 0   ;;  %s1676_s25 = smov 0  }
   0x9   :  { %s1678_s26 = smov 0   ;;  %s1680_s27 = smov 0  }
   0xa   :  { %s1682_s28 = smov 0  }
   0xb LB: > { %2119 = sst [smem:[#allocation9_spill]] %s1600_s23  ;;  %s1107_s29 = sadd.s32 4294967295, %s1620_s28   ;;  %s1620_s28 = sphi %s1682_s28, %s22_s28   ;;  %s1616_s27 = sphi %s1680_s27, %s2143_s27   ;;  %s1612_s26 = sphi %s1678_s26, %s2142_s26   ;;  %s1608_s25 = sphi %s1676_s25, %s2141_s25   ;;  %s1604_s24 = sphi %s1674_s24, %s2140_s24   ;;  %s1600_s23 = sphi %s1672_s23, %s2132_s23   ;;  %s1596_s22 = sphi %s1670_s22, %s2139_s22   ;;  %s1592_s21 = sphi %s1668_s21, %s2138_s21   ;;  %s1588_s20 = sphi %s1666_s20, %s2137_s20   ;;  %s1584_s19 = sphi %s1664_s19, %s2136_s19   ;;  %s1580_s18 = sphi %s1662_s18, %s2135_s18  }
   0xc   : > { %s1108_s30 = sadd.s32 4294967294, %s1620_s28   ;;  %s31_s6 = sadd.s32 1, %s1612_s26 }
   0xd   : > { %s34_s7 = sadd.s32 1, %s1616_s27  ;;  %p32_p0 = scmp.ge.s32.totalorder %s31_s6, 2 }
   0xe   : > { %s69_s8 = sadd.s32 1, %s1600_s23  ;;  %p76_p1 = scmp.ne.s32.totalorder %s1600_s23, %s1596_s22 }
   0xf   : > { %p77_p2 = scmp.eq.s32.totalorder %s1620_s28, 0  ;;  %s2145_s6 = smov (%p32_p0, %s31_s6), 0 }
  0x10   : > { %2120 = sst [smem:[#allocation10_spill]] %s2145_s6  ;;  %s2147_s7 = smov (!%p32_p0, %s34_s7), %s1616_s27 }
  0x11   : > { %s64_s9 = ssub.s32 %s1612_s26, %s2145_s6  ;;  %p1728_p3 = por %p77_p2, %p76_p1 }
  0x12   : > { %p36_p4 = scmp.ge.s32.totalorder %s2147_s7, 2  ;;  %p82_p5 = scmp.ne.s32.totalorder %s1596_s22, %s1592_s21 }
  0x13   : > { %p83_p6 = scmp.eq.s32.totalorder %s1107_s29, 0  ;;  %s163_s11 = sadd.s32 1, %s1588_s20 }
  0x14   : > { %s2149_s7 = smov (%p36_p4, %s2147_s7), 0  ;;  %p173_p8 = scmp.ne.s32.totalorder %s1588_s20, %s1584_s19 }
  0x15   : > { %2122 = sst [smem:[#allocation11_spill]] %s2149_s7  ;;  %p1736_p7 = por %p83_p6, %p82_p5 }
  0x16   : > { %s65_s13 = ssub.s32 %s1616_s27, %s2149_s7  ;;  %p174_p9 = scmp.eq.s32.totalorder %s1107_s29, 3 }
  0x17   : > { %s66_s14 = sor.u32 %s65_s13, %s64_s9  ;;  %p161_p10 = scmp.eq.s32.totalorder %s65_s13, 0 }
  0x18   : > { %p67_p11 = scmp.eq.s32.totalorder %s66_s14, 0  ;;  %p1744_p12 = por %p174_p9, %p173_p8 }
  0x19   : > { %s1749_s16 = scalar_select %p161_p10, %s1588_s20, %s163_s11  }
  0x1a   : > { %s2124_s15 = scalar_select %p1744_p12, 1, 0 }
  0x1b   : > { %s1752_s17 = scalar_select %p67_p11, %s1600_s23, %s69_s8  }
  0x1c   : > { %2125 = sst [smem:[#allocation12_spill]] %s2124_s15  ;;  %p179_p13 = scmp.ne.s32.totalorder %s1584_s19, %s1580_s18 }
  0x1d   : > { %2126 = sst [smem:[#allocation13_spill]] %s1752_s17  ;;  %p180_p0 = scmp.eq.s32.totalorder %s1108_s30, 3 }
  0x1e   : > { %p1340_p1 = scmp.lt.s32.totalorder %s1620_s28, 4  ;;  %s215_s29 = sand.u32 1, %s1600_s23  }
  0x1f   : > { %p1757_p2 = por %p180_p0, %p179_p13  ;;  %s1111_s9 = sshll.u32 %s215_s29, 7 }
  0x20   : > { %s1146_s13 = sshll.u32 %s1612_s26, 5  ;;  %s219_s7 = scalar_lea.vmem [#allocation3], %s1111_s9 }
  0x21   : > { %s225_s14 = sadd.s32 %s1616_s27, %s1146_s13  ;;  %s228_s6 = sshll.u32 %s219_s7, 4  ;;  %s229_s6 = int_to_ptr.vmem [resolvable:$true] %s228_s6 }
  0x22   : > { %s1114_s5 = sshll.u32 %s225_s14, 7  ;;  %p1769_p4 = pnand %p1340_p1, %p1728_p3 }
  0x23   : > { %s227_s8 = scalar_lea.hbm %s2107_s1, %s1114_s5  ;;  %s216_s17 = scalar_lea.sflag [#allocation4], %s215_s29 }
  0x24   : > { %p1474_p5 = pneg %p1769_p4  ;;  %s1485_s23 = scalar_lea.vmem %s229_s6, 2048 }
  0x25   : > { %p1486_p6 = scmp.ne.s32.totalorder %s229_s6, %s1485_s23  ;;  %s1622_s7 = smov [#allocation3]  }
  0x26   : > { %s1490_s9 = sshll.u32 %s1622_s7, 4  ;;  %s1491_s9 = int_to_ptr.vmem [resolvable:$false] %s1490_s9 }
  0x27   : > { %p1488_p8 = pnand %p1486_p6, %p1474_p5  ;;  %s1492_s13 = scalar_lea.vmem %s1491_s9, 4096 }
  0x28   : > { %p1493_p10 = scmp.lt.s32.totalorder %s229_s6, %s1491_s9  ;;  %p1494_p11 = scmp.lt.s32.totalorder %s1492_s13, %s1485_s23 }
  0x29   : > { %p1489_p9 = pneg %p1488_p8 }
  0x2a   : > { %p1495_p13 = por %p1494_p11, %p1493_p10 }
  0x2c   : > { %p1496_p0 = pnand %p1495_p13, %p1489_p9 }
  0x2e   : > { %1499 = shalt.err (!%p1496_p0)
}
  0x2f   : > { %s1623_s5 = smov 256   ;;  %s1624_s10 = smov 128  }
  0x30   : > { %s1625_s15 = smov 8   ;;  %p1115_p3 = scmp.ge.s32.totalorder %s1620_s28, 1 }
  0x31   : > { %1335 = dma.hbm_to_vmem [thread:$0]  (!%p1769_p4), %s227_s8, 2048, %s229_s6, %s216_s17, %s1623_s5, %s1624_s10, %s1625_s15  }
  0x32   : > { %p236_p1 = scmp.lt.s32.totalorder %s1620_s28, 5 }
  0x34   : > { %p237_p5 = pnand %p1115_p3, %p236_p1 }
  0x35   : > { %s242_s29 = sand.u32 (!%p237_p5), 1, %s1596_s22  }
  0x36   : > { %240 = sbr.rel (%p237_p5) target bundleno = 708 (0x2c4), region = 36  ;;  %s1116_s14 = sshll.u32 (!%p237_p5), %s242_s29, 7 }
  0x37   : > { %s243_s23 = scalar_lea.sflag (!%p237_p5), [#allocation4], %s242_s29  ;;  %s1780_s11 = scalar_lea.vmem (!%p237_p5), [#allocation3], %s1116_s14 }
  0x3b   : > { %1571 = dma.done.wait (%p1736_p7), %s243_s23, 2048  }
  0x3c   : > { %1573 = vsyncadd (%p1736_p7), %s243_s23, 4294965248  ;;  %s280_s6 = sand.u32 1, %s1584_s19   ;;  %s1118_s17 = sshll.u32 %s1608_s25, 4 }
  0x3d   : > { %s1117_s8 = sshll.u32 %s280_s6, 7  ;;  %p284_p4 = scmp.lt.s32.totalorder %s1118_s17, 31 }
  0x3e   : > { %s1800_s15 = scalar_lea.vmem [#allocation6], %s1117_s8  ;;  %p1122_p7 = scmp.ne.s32.totalorder %s1604_s24, 0 }
  0x3f   : > { %s2151_s17 = smov (!%p284_p4, %s1118_s17), 31 }
  0x40   : > { %s1119_s30 = sshll.u32 %s2151_s17, 3  ;;  %300 = sbr.rel (%p1122_p7) target bundleno = 78 (0x4e), region = 44 }
  0x41   : > { %s1793_s13 = scalar_lea.vmem %s2106_s0, %s1119_s30  ;;  %s1798_s12 = scalar_lea.vmem %s2110_s4, %s1119_s30 }
  0x45   : > { %vm301_vm0 = vcmask 7168   ;;  %v1626_v0 = vmov 0.0  }
  0x46   : > { %302 = vst.msk [vmem:[#allocation2] sm:$0xff] %vm301_vm0, %v1626_v0  ;;  %303 = vst.msk [vmem:[#allocation2 + $0x8] sm:$0xff] %vm301_vm0, %v1626_v0 }
  0x47   : > { %304 = vst.msk [vmem:[#allocation2 + $0x10] sm:$0xff] %vm301_vm0, %v1626_v0  ;;  %305 = vst.msk [vmem:[#allocation2 + $0x18] sm:$0xff] %vm301_vm0, %v1626_v0 }
  0x48   : > { %306 = vst.msk [vmem:[#allocation2 + $0x20] sm:$0xff] %vm301_vm0, %v1626_v0  ;;  %307 = vst.msk [vmem:[#allocation2 + $0x28] sm:$0xff] %vm301_vm0, %v1626_v0 }
  0x49   : > { %308 = vst.msk [vmem:[#allocation2 + $0x30] sm:$0xff] %vm301_vm0, %v1626_v0  ;;  %309 = vst.msk [vmem:[#allocation2 + $0x38] sm:$0xff] %vm301_vm0, %v1626_v0 }
  0x4a   : > { %310 = vst.msk [vmem:[#allocation2 + $0x40] sm:$0xff] %vm301_vm0, %v1626_v0  ;;  %311 = vst.msk [vmem:[#allocation2 + $0x48] sm:$0xff] %vm301_vm0, %v1626_v0 }
  0x4b   : > { %312 = vst.msk [vmem:[#allocation2 + $0x50] sm:$0xff] %vm301_vm0, %v1626_v0  ;;  %313 = vst.msk [vmem:[#allocation2 + $0x58] sm:$0xff] %vm301_vm0, %v1626_v0 }
  0x4c   : > { %314 = vst.msk [vmem:[#allocation2 + $0x60] sm:$0xff] %vm301_vm0, %v1626_v0  ;;  %315 = vst.msk [vmem:[#allocation2 + $0x68] sm:$0xff] %vm301_vm0, %v1626_v0 }
  0x4d   : > { %316 = vst.msk [vmem:[#allocation2 + $0x70] sm:$0xff] %vm301_vm0, %v1626_v0  ;;  %317 = vst.msk [vmem:[#allocation2 + $0x78] sm:$0xff] %vm301_vm0, %v1626_v0 }
  0x4e PF: > { %v334_v1 = vld [vmem:[%s1780_s11] sm:$0xff]  ;;  %v1627_v2 = vmov 1.0   ;;  %v335_v3 = vld [vmem:[%s1780_s11 + $0x8] sm:$0xff]  ;;  %v336_v4 = vld [vmem:[%s1780_s11 + $0x10] sm:$0xff]  ;;  %vm543_vm1 = vcmask 7168   ;;  %p1123_p6 = scmp.ne.s32.totalorder %s1604_s24, 1 }
  0x4f   : > { %350 = vxpose.xlu0.b32.start [1/16] %v334_v1, 128  ;;  %1200 = vmatprep.subr.mxu0 %v1627_v2  ;;  %v337_v5 = vld [vmem:[%s1780_s11 + $0x18] sm:$0xff]  ;;  %v338_v6 = vld [vmem:[%s1780_s11 + $0x20] sm:$0xff]  ;;  %v339_v7 = vld [vmem:[%s1780_s11 + $0x28] sm:$0xff] }
  0x50   : > { %1201 = vmatpush3.msra.mxu0 %v1627_v2  ;;  %1288 = vmatprep.subr.mxu1 %v1627_v2  ;;  %v340_v8 = vld [vmem:[%s1780_s11 + $0x30] sm:$0xff]  ;;  %v341_v9 = vld [vmem:[%s1780_s11 + $0x38] sm:$0xff]  ;;  %v342_v10 = vld [vmem:[%s1780_s11 + $0x40] sm:$0xff] }
  0x51   : > { %1202 = vmatprep.subr.mxu0 %v1627_v2  ;;  %1304 = vmatpush3.msra.mxu1 %v1627_v2  ;;  %v343_v11 = vld [vmem:[%s1780_s11 + $0x48] sm:$0xff]  ;;  %v344_v12 = vld [vmem:[%s1780_s11 + $0x50] sm:$0xff]  ;;  %v345_v13 = vld [vmem:[%s1780_s11 + $0x58] sm:$0xff] }
  0x52   : > { %1203 = vmatpush3.msra.mxu0 %v1627_v2  ;;  %1289 = vmatprep.subr.mxu1 %v1627_v2  ;;  %v346_v14 = vld [vmem:[%s1780_s11 + $0x60] sm:$0xff]  ;;  %v347_v15 = vld [vmem:[%s1780_s11 + $0x68] sm:$0xff]  ;;  %v348_v16 = vld [vmem:[%s1780_s11 + $0x70] sm:$0xff] }
  0x53   : > { %351 = vxpose.xlu0.b32.cont [2/16] %v335_v3, 128  ;;  %1204 = vmatprep.subr.mxu0 %v1627_v2  ;;  %v349_v17 = vld [vmem:[%s1780_s11 + $0x78] sm:$0xff]  ;;  %v319_v34 = vld [vmem:[#allocation2 + $0x8] sm:$0xff]  ;;  %v318_v36 = vld [vmem:[#allocation2] sm:$0xff] }
  0x54   : > { %1205 = vmatpush3.msra.mxu0 %v1627_v2  ;;  %1305 = vmatpush3.msra.mxu1 %v1627_v2  ;;  %v321_v40 = vld [vmem:[#allocation2 + $0x18] sm:$0xff]  ;;  %v320_v42 = vld [vmem:[#allocation2 + $0x10] sm:$0xff]  ;;  %v323_v46 = vld [vmem:[#allocation2 + $0x28] sm:$0xff] }
  0x55   : > { %1206 = vmatprep.subr.mxu0 %v1627_v2  ;;  %1290 = vmatprep.subr.mxu1 %v1627_v2  ;;  %v322_v48 = vld [vmem:[#allocation2 + $0x20] sm:$0xff]  ;;  %v325_v52 = vld [vmem:[#allocation2 + $0x38] sm:$0xff]  ;;  %v324_v54 = vld [vmem:[#allocation2 + $0x30] sm:$0xff] }
  0x56   : > { %1207 = vmatpush3.msra.mxu0 %v1627_v2  ;;  %1306 = vmatpush3.msra.mxu1 %v1627_v2  ;;  %v327_v58 = vld [vmem:[#allocation2 + $0x48] sm:$0xff]  ;;  %v326_v60 = vld [vmem:[#allocation2 + $0x40] sm:$0xff]  ;;  %v329_v0 = vld [vmem:[#allocation2 + $0x58] sm:$0xff] }
  0x57   : > { %352 = vxpose.xlu0.b32.cont [3/16] %v336_v4, 128  ;;  %1208 = vmatprep.subr.mxu0 %v1627_v2 }
  0x58   : > { %1209 = vmatpush3.msra.mxu0 %v1627_v2  ;;  %1291 = vmatprep.subr.mxu1 %v1627_v2 }
  0x59   : > { %1210 = vmatprep.subr.mxu0 %v1627_v2  ;;  %1307 = vmatpush3.msra.mxu1 %v1627_v2 }
  0x5a   : > { %1211 = vmatpush3.msra.mxu0 %v1627_v2  ;;  %1292 = vmatprep.subr.mxu1 %v1627_v2 }
  0x5b   : > { %353 = vxpose.xlu0.b32.cont [4/16] %v337_v5, 128  ;;  %1212 = vmatprep.subr.mxu0 %v1627_v2 }
  0x5c   : > { %1213 = vmatpush3.msra.mxu0 %v1627_v2  ;;  %1308 = vmatpush3.msra.mxu1 %v1627_v2 }
  0x5d   : > { %1214 = vmatprep.subr.mxu0 %v1627_v2  ;;  %1293 = vmatprep.subr.mxu1 %v1627_v2 }
  0x5e   : > { %1215 = vmatpush3.msra.mxu0 %v1627_v2  ;;  %1309 = vmatpush3.msra.mxu1 %v1627_v2 }
  0x5f   : > { %354 = vxpose.xlu0.b32.cont [5/16] %v338_v6, 128  ;;  %1216 = vmatprep.subr.mxu0 %v1627_v2  ;;  %v331_v6 = vld [vmem:[#allocation2 + $0x68] sm:$0xff] }
  0x60   : > { %1217 = vmatpush3.msra.mxu0 %v1627_v2  ;;  %1294 = vmatprep.subr.mxu1 %v1627_v2 }
  0x61   : > { %1218 = vmatprep.subr.mxu0 %v1627_v2  ;;  %1310 = vmatpush3.msra.mxu1 %v1627_v2 }
  0x62   : > { %1219 = vmatpush3.msra.mxu0 %v1627_v2  ;;  %1295 = vmatprep.subr.mxu1 %v1627_v2 }
  0x63   : > { %355 = vxpose.xlu0.b32.cont [6/16] %v339_v7, 128  ;;  %1220 = vmatprep.subr.mxu0 %v1627_v2 }
  0x64   : > { %1221 = vmatpush3.msra.mxu0 %v1627_v2  ;;  %1311 = vmatpush3.msra.mxu1 %v1627_v2 }
  0x65   : > { %1222 = vmatprep.subr.mxu0 %v1627_v2  ;;  %1296 = vmatprep.subr.mxu1 %v1627_v2 }
  0x66   : > { %1223 = vmatpush3.msra.mxu0 %v1627_v2  ;;  %1312 = vmatpush3.msra.mxu1 %v1627_v2 }
  0x67   : > { %356 = vxpose.xlu0.b32.cont [7/16] %v340_v8, 128  ;;  %1224 = vmatprep.subr.mxu0 %v1627_v2  ;;  %v330_v8 = vld [vmem:[#allocation2 + $0x60] sm:$0xff] }
  0x68   : > { %1225 = vmatpush3.msra.mxu0 %v1627_v2  ;;  %1297 = vmatprep.subr.mxu1 %v1627_v2 }
  0x69   : > { %1226 = vmatprep.subr.mxu0 %v1627_v2  ;;  %1313 = vmatpush3.msra.mxu1 %v1627_v2 }
  0x6a   : > { %1227 = vmatpush3.msra.mxu0 %v1627_v2  ;;  %1298 = vmatprep.subr.mxu1 %v1627_v2 }
  0x6b   : > { %357 = vxpose.xlu0.b32.cont [8/16] %v341_v9, 128  ;;  %1228 = vmatprep.subr.mxu0 %v1627_v2 }
  0x6c   : > { %1229 = vmatpush3.msra.mxu0 %v1627_v2  ;;  %1314 = vmatpush3.msra.mxu1 %v1627_v2 }
  0x6d   : > { %1230 = vmatprep.subr.mxu0 %v1627_v2  ;;  %1299 = vmatprep.subr.mxu1 %v1627_v2 }
  0x6e   : > { %1231 = vmatpush3.msra.mxu0 %v1627_v2  ;;  %1315 = vmatpush3.msra.mxu1 %v1627_v2 }
  0x6f   : > { %358 = vxpose.xlu0.b32.cont [9/16] %v342_v10, 128  ;;  %1300 = vmatprep.subr.mxu1 %v1627_v2 }
  0x70   : > { %1316 = vmatpush3.msra.mxu1 %v1627_v2 }
  0x71   : > { %1301 = vmatprep.subr.mxu1 %v1627_v2 }
  0x72   : > { %1317 = vmatpush3.msra.mxu1 %v1627_v2 }
  0x73   : > { %359 = vxpose.xlu0.b32.cont [10/16] %v343_v11, 128  ;;  %1302 = vmatprep.subr.mxu1 %v1627_v2 }
  0x74   : > { %1318 = vmatpush3.msra.mxu1 %v1627_v2 }
  0x75   : > { %1303 = vmatprep.subr.mxu1 %v1627_v2 }
  0x76   : > { %1319 = vmatpush3.msra.mxu1 %v1627_v2  ;;  %v328_v2 = vld [vmem:[#allocation2 + $0x50] sm:$0xff] }
  0x77   : > { %360 = vxpose.xlu0.b32.cont [11/16] %v344_v12, 128  ;;  %v333_v12 = vld [vmem:[#allocation2 + $0x78] sm:$0xff] }
  0x7b   : > { %361 = vxpose.xlu0.b32.cont [12/16] %v345_v13, 128 }
  0x7f   : > { %362 = vxpose.xlu0.b32.cont [13/16] %v346_v14, 128  ;;  %v332_v14 = vld [vmem:[#allocation2 + $0x70] sm:$0xff] }
  0x83   : > { %363 = vxpose.xlu0.b32.cont [14/16] %v347_v15, 128 }
  0x87   : > { %364 = vxpose.xlu0.b32.cont [15/16] %v348_v16, 128 }
  0x8b   : > { %365 = vxpose.xlu0.b32.end [16/16] %v349_v17, 128 }
  0xcb   : > { %v366_v18 = vpop.trf.xlu0 }
  0xcc   : > { %1232 = vmatprep.mubr.f32.mxu0 %v366_v18 }
  0xcf   : > { %v367_v19 = vpop.trf.xlu0 }
  0xd0   : > { %1233 = vmatmul.mubr.f32.vlgmr.msra.gmra.mxu0 %v367_v19 }
  0xd3   : > { %v368_v20 = vpop.trf.xlu0 }
  0xd4   : > { %1235 = vmatprep.mubr.f32.mxu0 %v368_v20 }
  0xd7   : > { %v369_v21 = vpop.trf.xlu0 }
  0xd8   : > { %1236 = vmatmul.mubr.f32.gmra.mxu0 %v369_v21 }
  0xdb   : > { %v370_v22 = vpop.trf.xlu0 }
  0xdc   : > { %1238 = vmatprep.mubr.f32.mxu0 %v370_v22 }
  0xdf   : > { %v371_v23 = vpop.trf.xlu0 }
  0xe0   : > { %1239 = vmatmul.mubr.f32.gmra.mxu0 %v371_v23 }
  0xe3   : > { %v372_v24 = vpop.trf.xlu0 }
  0xe4   : > { %1241 = vmatprep.mubr.f32.mxu0 %v372_v24 }
  0xe7   : > { %v373_v25 = vpop.trf.xlu0 }
  0xe8   : > { %1242 = vmatmul.mubr.f32.gmra.mxu0 %v373_v25 }
  0xeb   : > { %v374_v26 = vpop.trf.xlu0 }
  0xec   : > { %1244 = vmatprep.mubr.f32.mxu1 %v374_v26 }
  0xef   : > { %v375_v27 = vpop.trf.xlu0 }
  0xf0   : > { %1245 = vmatmul.mubr.f32.vlgmr.msra.gmra.mxu1 %v375_v27 }
  0xf3   : > { %v376_v28 = vpop.trf.xlu0 }
  0xf4   : > { %1247 = vmatprep.mubr.f32.mxu1 %v376_v28 }
  0xf7   : > { %v377_v29 = vpop.trf.xlu0 }
  0xf8   : > { %1248 = vmatmul.mubr.f32.gmra.mxu1 %v377_v29 }
  0xfb   : > { %v378_v30 = vpop.trf.xlu0 }
  0xfc   : > { %1250 = vmatprep.mubr.f32.mxu1 %v378_v30 }
  0xff   : > { %v379_v31 = vpop.trf.xlu0 }
 0x100   : > { %1251 = vmatmul.mubr.f32.gmra.mxu1 %v379_v31 }
 0x103   : > { %v380_v32 = vpop.trf.xlu0 }
 0x104   : > { %1253 = vmatprep.mubr.f32.mxu1 %v380_v32 }
 0x107   : > { %v381_v33 = vpop.trf.xlu0 }
 0x108   : > { %1254 = vmatmul.mubr.f32.gmra.mxu1 %v381_v33 }
 0x190   : > { %v1234_v35 = vpop.f32.mrf.mxu0 }
 0x191   : > { %v528_v37 = vadd.f32 %v1234_v35, %v319_v34 }
 0x192   : > { %v448_v38 = vpop.f32.mrf.mxu0 }
 0x193   : > { %545 = vst.msk [vmem:[#allocation2 + $0x8] sm:$0xff] %vm543_vm1, %v528_v37  ;;  %v527_v39 = vadd.f32 %v448_v38, %v318_v36 }
 0x195   : > { %544 = vst.msk [vmem:[#allocation2] sm:$0xff] %vm543_vm1, %v527_v39 }
 0x198   : > { %v1237_v41 = vpop.f32.mrf.mxu0 }
 0x199   : > { %v530_v43 = vadd.f32 %v1237_v41, %v321_v40 }
 0x19a   : > { %v458_v44 = vpop.f32.mrf.mxu0 }
 0x19b   : > { %547 = vst.msk [vmem:[#allocation2 + $0x18] sm:$0xff] %vm543_vm1, %v530_v43  ;;  %v529_v45 = vadd.f32 %v458_v44, %v320_v42 }
 0x19d   : > { %546 = vst.msk [vmem:[#allocation2 + $0x10] sm:$0xff] %vm543_vm1, %v529_v45 }
 0x1a0   : > { %v1240_v47 = vpop.f32.mrf.mxu0 }
 0x1a1   : > { %v532_v49 = vadd.f32 %v1240_v47, %v323_v46 }
 0x1a2   : > { %v468_v50 = vpop.f32.mrf.mxu0 }
 0x1a3   : > { %549 = vst.msk [vmem:[#allocation2 + $0x28] sm:$0xff] %vm543_vm1, %v532_v49  ;;  %v531_v51 = vadd.f32 %v468_v50, %v322_v48 }
 0x1a5   : > { %548 = vst.msk [vmem:[#allocation2 + $0x20] sm:$0xff] %vm543_vm1, %v531_v51 }
 0x1a8   : > { %v1243_v53 = vpop.f32.mrf.mxu0 }
 0x1a9   : > { %v534_v55 = vadd.f32 %v1243_v53, %v325_v52 }
 0x1aa   : > { %v478_v56 = vpop.f32.mrf.mxu0 }
 0x1ab   : > { %551 = vst.msk [vmem:[#allocation2 + $0x38] sm:$0xff] %vm543_vm1, %v534_v55  ;;  %v533_v57 = vadd.f32 %v478_v56, %v324_v54 }
 0x1ad   : > { %550 = vst.msk [vmem:[#allocation2 + $0x30] sm:$0xff] %vm543_vm1, %v533_v57 }
 0x1b0   : > { %v1246_v59 = vpop.f32.mrf.mxu1 }
 0x1b1   : > { %v536_v61 = vadd.f32 %v1246_v59, %v327_v58 }
 0x1b2   : > { %v488_v62 = vpop.f32.mrf.mxu1 }
 0x1b3   : > { %553 = vst.msk [vmem:[#allocation2 + $0x48] sm:$0xff] %vm543_vm1, %v536_v61  ;;  %v535_v63 = vadd.f32 %v488_v62, %v326_v60 }
 0x1b5   : > { %552 = vst.msk [vmem:[#allocation2 + $0x40] sm:$0xff] %vm543_vm1, %v535_v63 }
 0x1b8   : > { %v1249_v1 = vpop.f32.mrf.mxu1 }
 0x1b9   : > { %v538_v3 = vadd.f32 %v1249_v1, %v329_v0 }
 0x1ba   : > { %v498_v4 = vpop.f32.mrf.mxu1 }
 0x1bb   : > { %555 = vst.msk [vmem:[#allocation2 + $0x58] sm:$0xff] %vm543_vm1, %v538_v3  ;;  %v537_v5 = vadd.f32 %v498_v4, %v328_v2 }
 0x1bd   : > { %554 = vst.msk [vmem:[#allocation2 + $0x50] sm:$0xff] %vm543_vm1, %v537_v5 }
 0x1c0   : > { %v1252_v7 = vpop.f32.mrf.mxu1 }
 0x1c1   : > { %v540_v9 = vadd.f32 %v1252_v7, %v331_v6 }
 0x1c2   : > { %v508_v10 = vpop.f32.mrf.mxu1 }
 0x1c3   : > { %557 = vst.msk [vmem:[#allocation2 + $0x68] sm:$0xff] %vm543_vm1, %v540_v9  ;;  %v539_v11 = vadd.f32 %v508_v10, %v330_v8 }
 0x1c5   : > { %556 = vst.msk [vmem:[#allocation2 + $0x60] sm:$0xff] %vm543_vm1, %v539_v11 }
 0x1c8   : > { %v1255_v13 = vpop.f32.mrf.mxu1 }
 0x1c9   : > { %v542_v15 = vadd.f32 %v1255_v13, %v333_v12  ;;  %563 = sbr.rel (%p1123_p6) target bundleno = 684 (0x2ac), region = 48 }
 0x1ca   : > { %v518_v16 = vpop.f32.mrf.mxu1 }
 0x1cb   : > { %559 = vst.msk [vmem:[#allocation2 + $0x78] sm:$0xff] %vm543_vm1, %v542_v15  ;;  %v541_v17 = vadd.f32 %v518_v16, %v332_v14 }
 0x1cd   : > { %558 = vst.msk [vmem:[#allocation2 + $0x70] sm:$0xff] %vm543_vm1, %v541_v17 }
 0x1ce   : > { %v647_v18 = vld [vmem:[%s2108_s2 + $0x18] sm:$0xff]  ;;  %v646_v19 = vld [vmem:[%s2108_s2 + $0x10] sm:$0xff]  ;;  %v645_v20 = vld [vmem:[%s2108_s2 + $0x8] sm:$0xff]  ;;  %vm655_vm2 = vcmask 261120   ;;  %v1628_v49 = vmov 0  }
 0x1cf   : > { %1256 = vmatprep.subr.mxu0 %v647_v18  ;;  %1320 = vmatprep.subr.mxu1 %v647_v18  ;;  %v644_v21 = vld [vmem:[%s2108_s2] sm:$0xff]  ;;  %v629_v24 = vld [vmem:[%s1793_s13 + $0x8] sm:$0xff]  ;;  %v630_v26 = vld [vmem:[%s1793_s13 + $0x10] sm:$0xff] }
 0x1d0   : > { %1257 = vmatpush3.msra.mxu0 %v647_v18  ;;  %1324 = vmatpush3.msra.mxu1 %v647_v18  ;;  %v628_v22 = vld [vmem:[%s1793_s13] sm:$0xff]  ;;  %v637_v25 = vld [vmem:[%s1793_s13 + $0x48] sm:$0xff]  ;;  %v638_v27 = vld [vmem:[%s1793_s13 + $0x50] sm:$0xff] }
 0x1d1   : > { %1258 = vmatprep.subr.mxu0 %v646_v19  ;;  %1321 = vmatprep.subr.mxu1 %v646_v19  ;;  %v636_v23 = vld [vmem:[%s1793_s13 + $0x40] sm:$0xff]  ;;  %v566_v28 = vld [vmem:[#allocation2 + $0x10] sm:$0xff]  ;;  %v567_v31 = vld [vmem:[#allocation2 + $0x18] sm:$0xff] }
 0x1d2   : > { %1259 = vmatpush3.msra.mxu0 %v646_v19  ;;  %1325 = vmatpush3.msra.mxu1 %v646_v19  ;;  %v582_v29 = vadd.f32 1.0, %v566_v28  ;;  %v564_v30 = vld [vmem:[#allocation2] sm:$0xff]  ;;  %v565_v32 = vld [vmem:[#allocation2 + $0x8] sm:$0xff]  ;;  %v583_v34 = vadd.f32 1.0, %v567_v31  ;;  %v571_v38 = vld [vmem:[#allocation2 + $0x38] sm:$0xff] }
 0x1d3   : > { %1260 = vmatprep.subr.mxu0 %v645_v20  ;;  %1322 = vmatprep.subr.mxu1 %v645_v20  ;;  %v580_v33 = vadd.f32 1.0, %v564_v30  ;;  %v581_v35 = vadd.f32 1.0, %v565_v32  ;;  %v569_v36 = vld [vmem:[#allocation2 + $0x28] sm:$0xff]  ;;  %v568_v37 = vld [vmem:[#allocation2 + $0x20] sm:$0xff]  ;;  %v570_v40 = vld [vmem:[#allocation2 + $0x30] sm:$0xff]  ;;  %v587_v45 = vadd.f32 1.0, %v571_v38 }
 0x1d4   : > { %1261 = vmatpush3.msra.mxu0 %v645_v20  ;;  %1326 = vmatpush3.msra.mxu1 %v645_v20  ;;  %1440 = vrsqrt.f32 %v582_v29  ;;  %v585_v39 = vadd.f32 1.0, %v569_v36  ;;  %v584_v41 = vadd.f32 1.0, %v568_v37  ;;  %v573_v42 = vld [vmem:[#allocation2 + $0x48] sm:$0xff]  ;;  %v631_v43 = vld [vmem:[%s1793_s13 + $0x18] sm:$0xff]  ;;  %v572_v46 = vld [vmem:[#allocation2 + $0x40] sm:$0xff]  ;;  %v586_v50 = vadd.f32 1.0, %v570_v40 }
 0x1d5   : > { %1262 = vmatprep.subr.mxu0 %v644_v21  ;;  %1323 = vmatprep.subr.mxu1 %v644_v21  ;;  %1442 = vrsqrt.f32 %v580_v33  ;;  %v639_v44 = vld [vmem:[%s1793_s13 + $0x58] sm:$0xff]  ;;  %v632_v47 = vld [vmem:[%s1793_s13 + $0x20] sm:$0xff]  ;;  %v589_v52 = vadd.f32 1.0, %v573_v42  ;;  %v574_v53 = vld [vmem:[#allocation2 + $0x50] sm:$0xff]  ;;  %v588_v54 = vadd.f32 1.0, %v572_v46 }
 0x1d6   : > { %1263 = vmatpush3.msra.mxu0 %v644_v21  ;;  %1327 = vmatpush3.msra.mxu1 %v644_v21  ;;  %1444 = vrsqrt.f32 %v583_v34  ;;  %v640_v48 = vld [vmem:[%s1793_s13 + $0x60] sm:$0xff]  ;;  %v575_v51 = vld [vmem:[#allocation2 + $0x58] sm:$0xff]  ;;  %v577_v55 = vld [vmem:[#allocation2 + $0x68] sm:$0xff]  ;;  %v590_v62 = vadd.f32 1.0, %v574_v53 }
 0x1d7   : > { %1264 = vmatprep.mubr.msk.f32.mxu0 %vm655_vm2, %v628_v22  ;;  %1276 = vmatprep.mubr.msk.f32.mxu1 %vm655_vm2, %v636_v23  ;;  %1446 = vrsqrt.f32 %v581_v35  ;;  %v633_v56 = vld [vmem:[%s1793_s13 + $0x28] sm:$0xff]  ;;  %v591_v58 = vadd.f32 1.0, %v575_v51  ;;  %v576_v59 = vld [vmem:[#allocation2 + $0x60] sm:$0xff]  ;;  %v634_v60 = vld [vmem:[%s1793_s13 + $0x30] sm:$0xff]  ;;  %v593_v0 = vadd.f32 1.0, %v577_v55 }
 0x1d8   : > { %1265 = vmatmul.mubr.msk.f32.vlgmr.msra.gmra.mxu0 %vm655_vm2, %v629_v24  ;;  %1277 = vmatmul.mubr.msk.f32.vlgmr.msra.gmra.mxu1 %vm655_vm2, %v637_v25  ;;  %1448 = vrsqrt.f32 %v585_v39  ;;  %v641_v57 = vld [vmem:[%s1793_s13 + $0x68] sm:$0xff]  ;;  %v642_v61 = vld [vmem:[%s1793_s13 + $0x70] sm:$0xff]  ;;  %v579_v63 = vld [vmem:[#allocation2 + $0x78] sm:$0xff]  ;;  %v592_v2 = vadd.f32 1.0, %v576_v59 }
 0x1d9   : > { %1267 = vmatprep.mubr.msk.f32.mxu0 %vm655_vm2, %v630_v26  ;;  %1279 = vmatprep.mubr.msk.f32.mxu1 %vm655_vm2, %v638_v27  ;;  %1450 = vrsqrt.f32 %v584_v41  ;;  %v578_v1 = vld [vmem:[#allocation2 + $0x70] sm:$0xff]  ;;  %v635_v3 = vld [vmem:[%s1793_s13 + $0x38] sm:$0xff]  ;;  %v595_v5 = vadd.f32 1.0, %v579_v63  ;;  %v1999_v33 = vld [vmem:[%s2109_s3] ss:$0 sm:$0xff] }
 0x1da   : > { %1439 = vset.pattern.permute.xlu1 %v1628_v49  ;;  %1438 = vset.pattern.permute.xlu0 %v1628_v49  ;;  %1452 = vrsqrt.f32 %v587_v45  ;;  %v643_v4 = vld [vmem:[%s1793_s13 + $0x78] sm:$0xff]  ;;  %v594_v6 = vadd.f32 1.0, %v578_v1 }
 0x1db   : > { %1454 = vrsqrt.f32 %v586_v50 }
 0x1dc   : > { %1268 = vmatmul.mubr.msk.f32.gmra.mxu0 %vm655_vm2, %v631_v43  ;;  %1280 = vmatmul.mubr.msk.f32.gmra.mxu1 %vm655_vm2, %v639_v44  ;;  %1456 = vrsqrt.f32 %v589_v52 }
 0x1dd   : > { %1270 = vmatprep.mubr.msk.f32.mxu0 %vm655_vm2, %v632_v47  ;;  %1282 = vmatprep.mubr.msk.f32.mxu1 %vm655_vm2, %v640_v48  ;;  %1458 = vrsqrt.f32 %v588_v54 }
 0x1de   : > { %1460 = vrsqrt.f32 %v591_v58 }
 0x1df   : > { %1462 = vrsqrt.f32 %v590_v62 }
 0x1e0   : > { %1271 = vmatmul.mubr.msk.f32.gmra.mxu0 %vm655_vm2, %v633_v56  ;;  %1283 = vmatmul.mubr.msk.f32.gmra.mxu1 %vm655_vm2, %v641_v57  ;;  %1464 = vrsqrt.f32 %v593_v0 }
 0x1e1   : > { %1273 = vmatprep.mubr.msk.f32.mxu0 %vm655_vm2, %v634_v60  ;;  %1285 = vmatprep.mubr.msk.f32.mxu1 %vm655_vm2, %v642_v61  ;;  %v1441_v7 = vpop.eup %1440  ;;  %1466 = vrsqrt.f32 %v592_v2 }
 0x1e2   : > { %v1443_v8 = vpop.eup %1442  ;;  %861 = vperm.xlu1 %1439, %v1441_v7   ;;  %614 = vst.msk [vmem:[%s1798_s12 + $0x10] sm:$0xff] %vm543_vm1, %v1441_v7  ;;  %1468 = vrsqrt.f32 %v595_v5 }
 0x1e3   : > { %v1445_v9 = vpop.eup %1444  ;;  %851 = vperm.xlu0 %1438, %v1443_v8   ;;  %612 = vst.msk [vmem:[%s1798_s12] sm:$0xff] %vm543_vm1, %v1443_v8  ;;  %1470 = vrsqrt.f32 %v594_v6 }
 0x1e4   : > { %1274 = vmatmul.mubr.msk.f32.gmra.mxu0 %vm655_vm2, %v635_v3  ;;  %1286 = vmatmul.mubr.msk.f32.gmra.mxu1 %vm655_vm2, %v643_v4  ;;  %v1447_v10 = vpop.eup %1446  ;;  %615 = vst.msk [vmem:[%s1798_s12 + $0x18] sm:$0xff] %vm543_vm1, %v1445_v9 }
 0x1e5   : > { %v1449_v11 = vpop.eup %1448  ;;  %613 = vst.msk [vmem:[%s1798_s12 + $0x8] sm:$0xff] %vm543_vm1, %v1447_v10 }
 0x1e6   : > { %v1451_v12 = vpop.eup %1450  ;;  %866 = vperm.xlu1 %1439, %v1445_v9   ;;  %617 = vst.msk [vmem:[%s1798_s12 + $0x28] sm:$0xff] %vm543_vm1, %v1449_v11 }
 0x1e7   : > { %v1453_v13 = vpop.eup %1452  ;;  %856 = vperm.xlu0 %1438, %v1447_v10   ;;  %616 = vst.msk [vmem:[%s1798_s12 + $0x20] sm:$0xff] %vm543_vm1, %v1451_v12 }
 0x1e8   : > { %v1455_v14 = vpop.eup %1454  ;;  %619 = vst.msk [vmem:[%s1798_s12 + $0x38] sm:$0xff] %vm543_vm1, %v1453_v13 }
 0x1e9   : > { %v1457_v15 = vpop.eup %1456  ;;  %618 = vst.msk [vmem:[%s1798_s12 + $0x30] sm:$0xff] %vm543_vm1, %v1455_v14 }
 0x1ea   : > { %v1459_v16 = vpop.eup %1458  ;;  %876 = vperm.xlu1 %1439, %v1449_v11   ;;  %621 = vst.msk [vmem:[%s1798_s12 + $0x48] sm:$0xff] %vm543_vm1, %v1457_v15 }
 0x1eb   : > { %v1461_v17 = vpop.eup %1460  ;;  %871 = vperm.xlu0 %1438, %v1451_v12   ;;  %620 = vst.msk [vmem:[%s1798_s12 + $0x40] sm:$0xff] %vm543_vm1, %v1459_v16 }
 0x1ec   : > { %v1463_v18 = vpop.eup %1462  ;;  %623 = vst.msk [vmem:[%s1798_s12 + $0x58] sm:$0xff] %vm543_vm1, %v1461_v17 }
 0x1ed   : > { %v1465_v19 = vpop.eup %1464  ;;  %622 = vst.msk [vmem:[%s1798_s12 + $0x50] sm:$0xff] %vm543_vm1, %v1463_v18 }
 0x1ee   : > { %v1467_v20 = vpop.eup %1466  ;;  %886 = vperm.xlu1 %1439, %v1453_v13   ;;  %625 = vst.msk [vmem:[%s1798_s12 + $0x68] sm:$0xff] %vm543_vm1, %v1465_v19 }
 0x1ef   : > { %v1469_v21 = vpop.eup %1468  ;;  %881 = vperm.xlu0 %1438, %v1455_v14   ;;  %624 = vst.msk [vmem:[%s1798_s12 + $0x60] sm:$0xff] %vm543_vm1, %v1467_v20 }
 0x1f0   : > { %v1471_v22 = vpop.eup %1470  ;;  %627 = vst.msk [vmem:[%s1798_s12 + $0x78] sm:$0xff] %vm543_vm1, %v1469_v21 }
 0x1f1   : > { %626 = vst.msk [vmem:[%s1798_s12 + $0x70] sm:$0xff] %vm543_vm1, %v1471_v22 }
 0x1f2   : > { %896 = vperm.xlu1 %1439, %v1457_v15  }
 0x1f3   : > { %891 = vperm.xlu0 %1438, %v1459_v16  }
 0x1f6   : > { %906 = vperm.xlu1 %1439, %v1461_v17  }
 0x1f7   : > { %901 = vperm.xlu0 %1438, %v1463_v18  }
 0x1fa   : > { %916 = vperm.xlu1 %1439, %v1465_v19  }
 0x1fb   : > { %911 = vperm.xlu0 %1438, %v1467_v20  }
 0x1fe   : > { %926 = vperm.xlu1 %1439, %v1469_v21  }
 0x1ff   : > { %921 = vperm.xlu0 %1438, %v1471_v22  }
 0x25d   : > { %v862_v23 = vpop.permute.xlu1 %861 }
 0x25e   : > { %v852_v24 = vpop.permute.xlu0 %851 }
 0x261   : > { %v867_v25 = vpop.permute.xlu1 %866 }
 0x262   : > { %v857_v26 = vpop.permute.xlu0 %856 }
 0x265   : > { %v877_v27 = vpop.permute.xlu1 %876 }
 0x266   : > { %v872_v28 = vpop.permute.xlu0 %871 }
 0x269   : > { %v1992_v29 = vpop.permute.xlu1 %886 }
 0x26a   : > { %v1994_v30 = vpop.permute.xlu0 %881 }
 0x26d   : > { %v897_v31 = vpop.permute.xlu1 %896 }
 0x26e   : > { %v892_v32 = vpop.permute.xlu0 %891 }
 0x271   : > { %v907_v36 = vpop.permute.xlu1 %906 }
 0x272   : > { %v902_v41 = vpop.permute.xlu0 %901 }
 0x275   : > { %v917_v54 = vpop.permute.xlu1 %916 }
 0x276   : > { %v912_v61 = vpop.permute.xlu0 %911 }
 0x279   : > { %v927_v10 = vpop.permute.xlu1 %926 }
 0x27a   : > { %v922_v21 = vpop.permute.xlu0 %921 }
 0x298   : > { %v1266_v34 = vpop.f32.mrf.mxu0  ;;  %v1278_v35 = vpop.f32.mrf.mxu1 }
 0x299   : > { %v776_v37 = vadd.f32 %v1266_v34, %v1999_v33  ;;  %v816_v38 = vadd.f32 %v1278_v35, %v1999_v33 }
 0x29a   : > { %v770_v39 = vpop.f32.mrf.mxu0  ;;  %v810_v40 = vpop.f32.mrf.mxu1 }
 0x29b   : > { %v930_v42 = vmul.f32 %v857_v26, %v776_v37  ;;  %v938_v43 = vmul.f32 %v897_v31, %v816_v38  ;;  %v771_v44 = vadd.f32 %v1999_v33, %v770_v39  ;;  %v811_v45 = vadd.f32 %v1999_v33, %v810_v40 }
 0x29c   : > { %v1269_v46 = vpop.f32.mrf.mxu0  ;;  %v1281_v47 = vpop.f32.mrf.mxu1 }
 0x29d   : > { %946 = vst [vmem:[%s1800_s15 + $0x8] sm:$0xff] %v930_v42  ;;  %954 = vst [vmem:[%s1800_s15 + $0x48] sm:$0xff] %v938_v43  ;;  %v929_v48 = vmul.f32 %v852_v24, %v771_v44  ;;  %v937_v49 = vmul.f32 %v892_v32, %v811_v45  ;;  %v786_v50 = vadd.f32 %v1269_v46, %v1999_v33 }
 0x29e   : > { %v826_v51 = vadd.f32 %v1281_v47, %v1999_v33  ;;  %v780_v52 = vpop.f32.mrf.mxu0  ;;  %v820_v53 = vpop.f32.mrf.mxu1 }
 0x29f   : > { %945 = vst [vmem:[%s1800_s15] sm:$0xff] %v929_v48  ;;  %953 = vst [vmem:[%s1800_s15 + $0x40] sm:$0xff] %v937_v49  ;;  %v932_v55 = vmul.f32 %v867_v25, %v786_v50  ;;  %v781_v57 = vadd.f32 %v1999_v33, %v780_v52  ;;  %v821_v58 = vadd.f32 %v1999_v33, %v820_v53 }
 0x2a0   : > { %v940_v56 = vmul.f32 %v907_v36, %v826_v51  ;;  %v1272_v59 = vpop.f32.mrf.mxu0  ;;  %v1284_v60 = vpop.f32.mrf.mxu1 }
 0x2a1   : > { %948 = vst [vmem:[%s1800_s15 + $0x18] sm:$0xff] %v932_v55  ;;  %v931_v62 = vmul.f32 %v862_v23, %v781_v57  ;;  %v939_v63 = vmul.f32 %v902_v41, %v821_v58  ;;  %v796_v0 = vadd.f32 %v1272_v59, %v1999_v33  ;;  %v836_v1 = vadd.f32 %v1284_v60, %v1999_v33 }
 0x2a2   : > { %956 = vst [vmem:[%s1800_s15 + $0x58] sm:$0xff] %v940_v56  ;;  %v790_v2 = vpop.f32.mrf.mxu0  ;;  %v830_v3 = vpop.f32.mrf.mxu1 }
 0x2a3   : > { %947 = vst [vmem:[%s1800_s15 + $0x10] sm:$0xff] %v931_v62  ;;  %955 = vst [vmem:[%s1800_s15 + $0x50] sm:$0xff] %v939_v63  ;;  %v934_v4 = vmul.f32 %v877_v27, %v796_v0  ;;  %v942_v5 = vmul.f32 %v917_v54, %v836_v1  ;;  %v791_v6 = vadd.f32 %v1999_v33, %v790_v2 }
 0x2a4   : > { %v831_v7 = vadd.f32 %v1999_v33, %v830_v3  ;;  %v1275_v8 = vpop.f32.mrf.mxu0  ;;  %v1287_v9 = vpop.f32.mrf.mxu1 }
 0x2a5   : > { %950 = vst [vmem:[%s1800_s15 + $0x28] sm:$0xff] %v934_v4  ;;  %958 = vst [vmem:[%s1800_s15 + $0x68] sm:$0xff] %v942_v5  ;;  %v933_v11 = vmul.f32 %v872_v28, %v791_v6  ;;  %v806_v13 = vadd.f32 %v1275_v8, %v1999_v33  ;;  %v846_v14 = vadd.f32 %v1287_v9, %v1999_v33 }
 0x2a6   : > { %v941_v12 = vmul.f32 %v912_v61, %v831_v7  ;;  %v800_v15 = vpop.f32.mrf.mxu0  ;;  %v840_v16 = vpop.f32.mrf.mxu1 }
 0x2a7   : > { %949 = vst [vmem:[%s1800_s15 + $0x20] sm:$0xff] %v933_v11  ;;  %v936_v17 = vmul.f32 %v1992_v29, %v806_v13  ;;  %v944_v18 = vmul.f32 %v927_v10, %v846_v14  ;;  %v801_v19 = vadd.f32 %v1999_v33, %v800_v15  ;;  %v841_v20 = vadd.f32 %v1999_v33, %v840_v16 }
 0x2a8   : > { %957 = vst [vmem:[%s1800_s15 + $0x60] sm:$0xff] %v941_v12 }
 0x2a9   : > { %952 = vst [vmem:[%s1800_s15 + $0x38] sm:$0xff] %v936_v17  ;;  %960 = vst [vmem:[%s1800_s15 + $0x78] sm:$0xff] %v944_v18  ;;  %v935_v22 = vmul.f32 %v1994_v30, %v801_v19  ;;  %v943_v23 = vmul.f32 %v922_v21, %v841_v20 }
 0x2ab   : > { %951 = vst [vmem:[%s1800_s15 + $0x30] sm:$0xff] %v935_v22  ;;  %959 = vst [vmem:[%s1800_s15 + $0x70] sm:$0xff] %v943_v23 }
 0x2ac PF: > { %s1147_s5 = sshll.u32 %s1608_s25, 11  ;;  %s2130_s29 = sld [smem:[#allocation14_spill]] }
 0x2ad   : > { %s984_s23 = sshll.u32 %s1800_s15, 4  ;;  %s2046_s11 = scalar_lea.sflag [#allocation5], %s280_s6  ;;  %s2042_s23 = int_to_ptr.vmem [resolvable:$true] %s984_s23 }
 0x2ae   : > { %s1500_s17 = scalar_lea.vmem %s2042_s23, 2048  ;;  %s1629_s25 = smov [#allocation6]  }
 0x2af   : > { %p1501_p8 = scmp.ne.s32.totalorder %s2042_s23, %s1500_s17  ;;  %s1504_s8 = sshll.u32 %s1629_s25, 4  ;;  %s1505_s8 = int_to_ptr.vmem [resolvable:$false] %s1504_s8 }
 0x2b0   : > { %s1506_s24 = scalar_lea.vmem %s1505_s8, 4096  ;;  %p1507_p11 = scmp.lt.s32.totalorder %s2042_s23, %s1505_s8 }
 0x2b1   : > { %p1502_p9 = pnand %p1501_p8, %p1744_p12  ;;  %p1508_p13 = scmp.lt.s32.totalorder %s1506_s24, %s1500_s17 }
 0x2b2   : > { %s2039_s14 = scalar_lea.hbm %s2130_s29, %s1147_s5 }
 0x2b3   : > { %p1503_p10 = pneg %p1502_p9  ;;  %p1509_p0 = por %p1508_p13, %p1507_p11 }
 0x2b5   : > { %p1510_p3 = pnand %p1509_p0, %p1503_p10 }
 0x2b7   : > { %1513 = shalt.err (!%p1510_p3)
}
 0x2b8   : > { %s1514_s6 = scalar_lea.hbm %s2039_s14, 2048  ;;  %s1518_s7 = scalar_lea.hbm %s2130_s29, 4096 }
 0x2b9   : > { %p1515_p1 = scmp.ne.s32.totalorder %s2039_s14, %s1514_s6  ;;  %p1519_p7 = scmp.lt.s32.totalorder %s2039_s14, %s2130_s29 }
 0x2ba   : > { %p1520_p6 = scmp.lt.s32.totalorder %s1518_s7, %s1514_s6 }
 0x2bb   : > { %p1516_p5 = pnand %p1515_p1, %p1744_p12 }
 0x2bc   : > { %p1521_p8 = por %p1520_p6, %p1519_p7 }
 0x2bd   : > { %p1517_p4 = pneg %p1516_p5 }
 0x2bf   : > { %p1522_p9 = pnand %p1521_p8, %p1517_p4 }
 0x2c1   : > { %1525 = shalt.err (!%p1522_p9)
}
 0x2c2   : > { %s1630_s10 = smov 128   ;;  %s1631_s12 = smov 8  }
 0x2c3   : > { %1330 = dma.vmem_to_hbm [thread:$0]  (%p1744_p12), %s2042_s23, 2048, %s2039_s14, %s2046_s11, %s1630_s10, %s1630_s10, %s1631_s12  }
 0x2c4 PF: > { %p1341_p10 = scmp.ge.s32.totalorder %s1620_s28, 2  ;;  %s1007_s17 = sand.u32 1, %s1580_s18  }
 0x2c5   : > { %s1008_s25 = scalar_lea.sflag [#allocation5], %s1007_s17 }
 0x2c6   : > { %p1337_p11 = pnand %p1341_p10, %p1757_p2 }
 0x2c8   : > { %p1338_p13 = pneg %p1337_p11 }
 0x2ca   : > { %1575 = dma.done.wait (%p1338_p13), %s1008_s25, 2048  }
 0x2cb   : > { %1577 = vsyncadd (%p1338_p13), %s1008_s25, 4294965248  ;;  %s22_s28 = sadd.s32 1, %s1620_s28   ;;  %s2131_s13 = sld [smem:[#allocation9_spill]] }
 0x2cc   : > { %p19_p0 = scmp.ge.s32.totalorder %s22_s28, 6   ;;  %s2132_s23 = sld [smem:[#allocation13_spill]] }
 0x2cd   : > { %s2133_s14 = sld [smem:[#allocation10_spill]]  ;;  %s2135_s18 = smov %s1584_s19 }
 0x2ce   : > { %s2134_s11 = sld [smem:[#allocation11_spill]]  ;;  %s2136_s19 = smov %s1588_s20 }
 0x2cf   : > { %s2137_s20 = smov %s1749_s16  ;;  %s2138_s21 = smov %s1596_s22 }
 0x2d0   : > { %s2140_s24 = smov %s1612_s26  ;;  %s2141_s25 = smov %s1616_s27 }
 0x2d1   : > { %s2139_s22 = smov %s2131_s13  ;;  %21 = sbr.rel (!%p19_p0) target bundleno = 11 (0xb), region = 104 }
 0x2d3   : > { %s2142_s26 = smov %s2133_s14 }
 0x2d4   : > { %s2143_s27 = smov %s2134_s11 }
 0x2d6   :  { %1013 = vsyncpa [#allocation4], 1 }
 0x2d7   :  { %1015 = vsyncpa [#allocation4 + $0x1], 1 }
 0x2d8   :  { %1016 = vsyncpa [#allocation5], 1 }
 0x2d9   :  { %1018 = vsyncpa [#allocation5 + $0x1], 1 }

</bundles_post_ra>
